<compile_context>
chip_gen: v7x
topology: tpu7x:2x2x1
jax: 0.10.0
libtpu: 0.0.40
codegen_flags: <defaults>
</compile_context>

<pallas_src>
import functools

import jax
import jax.numpy as jnp
from jax import lax
from jax.experimental import pallas as pl
from jax.experimental.pallas import tpu as pltpu

_EPS = 1e-5  # nn.BatchNorm2d default eps


# ---------------------------------------------------------------------------
# Bilinear (align_corners=False, PyTorch semantics) 1-D interpolation matrix
# ---------------------------------------------------------------------------
def _interp_matrix(l_in, l_out):
    """Returns A (l_out, l_in) with out = A @ in, matching nn.Upsample(bilinear, ac=False)."""
    o = jnp.arange(l_out, dtype=jnp.float32)
    src = jnp.clip((o + 0.5) * (float(l_in) / float(l_out)) - 0.5, 0.0, float(l_in - 1))
    i0 = jnp.clip(jnp.floor(src).astype(jnp.int32), 0, l_in - 1)
    i1 = jnp.minimum(i0 + 1, l_in - 1)
    f = src - i0.astype(jnp.float32)
    rows = jnp.arange(l_out)
    a = jnp.zeros((l_out, l_in), jnp.float32)
    a = a.at[rows, i0].add(1.0 - f)
    a = a.at[rows, i1].add(f)
    return a


# ---------------------------------------------------------------------------
# One-time probe of pltpu.roll's rotation convention (cached; runs a tiny kernel once).
# Returns s such that pltpu.roll(x, s*k, axis)[p] == x[p - k]  (jnp.roll style <=> s=+1).
# ---------------------------------------------------------------------------
@functools.lru_cache(maxsize=None)
def _roll_sign():
    def probe(x_ref, o_ref):
        o_ref[...] = pltpu.roll(x_ref[...], 1, axis=1)

    with jax.ensure_compile_time_eval():
        x = jnp.arange(8 * 128, dtype=jnp.float32).reshape(8, 128)
        y = pl.pallas_call(probe, out_shape=jax.ShapeDtypeStruct((8, 128), jnp.float32))(x)
        return 1 if int(y[0, 1]) == 0 else -1


# ---------------------------------------------------------------------------
# Fused Pallas kernel: upsample + 5x [conv -> folded BN -> ReLU] per grid step.
# The activation stays (C, nb*HW) lane-dense in registers/VMEM for the whole body.
# ---------------------------------------------------------------------------
def _bnw_upsample_kernel(x_ref, kup_ref, w1_ref, w11_ref, w33_ref, b_ref, o_ref,
                         *, hu, wu, sgn):
    nb, cout, hw = o_ref.shape          # images this step, channels, Hup*Wup
    lanes = nb * hw

    # Boundary masks over the lane-packed layout (VPU iota; no extra operands / DMAs).
    p = lax.broadcasted_iota(jnp.int32, (1, lanes), 1)
    xpos = p % wu
    ypos = (p // wu) % hu
    lmask = (xpos > 0).astype(jnp.float32)          # column x-1 exists
    rmask = (xpos < wu - 1).astype(jnp.float32)     # column x+1 exists
    tmask = (ypos > 0).astype(jnp.float32)          # row y-1 exists (also blocks image bleed)
    bmask = (ypos < hu - 1).astype(jnp.float32)     # row y+1 exists

    # ---- Layer 1: 1x1 conv (BN scale folded) at *input* resolution, bilinear upsample as
    #      one MXU dot against the Kronecker interpolation matrix, then bias + ReLU.
    ups = []
    for b in range(nb):
        t = jnp.dot(w1_ref[...], x_ref[b], preferred_element_type=jnp.float32)  # (C, Hin*Win)
        ups.append(jnp.dot(t, kup_ref[...], preferred_element_type=jnp.float32))  # (C, HW)
    act = ups[0] if nb == 1 else jnp.concatenate(ups, axis=1)                     # (C, lanes)
    act = jnp.maximum(act + b_ref[0], 0.0)

    def conv1x1(a, w, bias):
        y = jnp.dot(w, a, preferred_element_type=jnp.float32)
        return jnp.maximum(y + bias, 0.0)

    def conv3x3(a, w_l, bias):
        # 8 shifted taps via XLU lane rotations + boundary masks; each tap is reduced with
        # its own small (C x C) MXU dot into an f32 register accumulator (no halo scratch,
        # no (9*C, lanes) concat materialization).
        acc = jnp.dot(w_l[4], a, preferred_element_type=jnp.float32)   # center tap (ky=kx=1)
        for ky in range(3):
            for kx in range(3):
                if ky == 1 and kx == 1:
                    continue
                shift = (ky - 1) * wu + (kx - 1)          # want v[p] = a[p + shift]
                v = pltpu.roll(a, (-shift * sgn) % lanes, axis=1)
                if kx == 0:
                    v = v * lmask
                elif kx == 2:
                    v = v * rmask
                if ky == 0:
                    v = v * tmask
                elif ky == 2:
                    v = v * bmask
                acc = acc + jnp.dot(w_l[ky * 3 + kx], v, preferred_element_type=jnp.float32)
        return jnp.maximum(acc + bias, 0.0)

    act = conv3x3(act, w33_ref.at[0], b_ref[1])
    act = conv1x1(act, w11_ref[0], b_ref[2])
    act = conv3x3(act, w33_ref.at[1], b_ref[3])
    act = conv1x1(act, w11_ref[1], b_ref[4])

    for b in range(nb):                                   # lane-dense stores (hw % 128 == 0)
        o_ref[b] = act[:, b * hw:(b + 1) * hw]


# ---------------------------------------------------------------------------
# BN folding and wrapper
# ---------------------------------------------------------------------------
def _fold_bn(lyr):
    cout = lyr["w"].shape[0]
    scale = lyr["gamma"] / jnp.sqrt(lyr["var"] + _EPS)
    bias = ((lyr["b"] - lyr["mean"]) * scale + lyr["beta"]).reshape(cout, 1)
    if lyr["w"].shape[-1] == 1:
        w = lyr["w"][:, :, 0, 0] * scale[:, None]                               # (Cout, Cin)
    else:
        # (Cout, Cin, 3, 3) -> (ky, kx, Cout, Cin) -> (9, Cout, Cin): tap t = ky*3 + kx
        w = jnp.transpose(lyr["w"], (2, 3, 0, 1)).reshape(9, cout, -1) * scale[None, :, None]
    return w, bias


def _images_per_step(n):
    # v7x has 2 TensorCores/chip: keep one image per "parallel" grid step so both stay busy.
    # Single-TC chips (v5e/v6e) pack the whole batch into one lane-dense step to remove the
    # serial per-step grid overhead.  Unknown devices default to the safe per-image grid.
    try:
        kind = jax.devices()[0].device_kind.lower()
    except Exception:
        return 1
    if any(t in kind for t in ("v5 lite", "v5e", "v6 lite", "v6e")):
        return n
    return 1


def forward_pallas(x_nchw, params, us):
    n, cin, h, w = x_nchw.shape
    cout = params["layers"][0]["w"].shape[0]
    hu, wu = h * us, w * us
    hw_in, hw = h * w, hu * wu

    x2 = x_nchw.reshape(n, cin, hw_in).astype(jnp.float32)

    # Separable bilinear upsample folded into one (hw_in, hw) matrix (see TODO in header).
    a_h = _interp_matrix(h, hu)
    a_w = _interp_matrix(w, wu)
    k_up = jnp.kron(a_h.T, a_w.T)                                               # (hw_in, hw)

    folded = [_fold_bn(l) for l in params["layers"]]
    w1 = folded[0][0]                                                           # (Cout, Cin)
    w33 = jnp.stack([folded[1][0], folded[3][0]])                               # (2,9,Cout,Cout)
    w11 = jnp.stack([folded[2][0], folded[4][0]])                               # (2,Cout,Cout)
    b_all = jnp.stack([f[1] for f in folded])                                   # (5,Cout,1)

    nb = _images_per_step(n)
    sgn = _roll_sign()

    def _const(a):
        nd = a.ndim
        return pl.BlockSpec(a.shape, lambda i, nd=nd: (0,) * nd)

    out = pl.pallas_call(
        functools.partial(_bnw_upsample_kernel, hu=hu, wu=wu, sgn=sgn),
        out_shape=jax.ShapeDtypeStruct((n, cout, hw), jnp.float32),
        grid=(n // nb,),
        in_specs=[
            pl.BlockSpec((nb, cin, hw_in), lambda i: (i, 0, 0)),
            _const(k_up), _const(w1), _const(w11), _const(w33), _const(b_all),
        ],
        out_specs=pl.BlockSpec((nb, cout, hw), lambda i: (i, 0, 0)),
        compiler_params=pltpu.CompilerParams(dimension_semantics=("parallel",)),
    )(x2, k_up, w1, w11, w33, b_all)

    return out.reshape(n, cout, hu, wu)       # already NCHW; no boundary transposes


# ---------------------------------------------------------------------------
# Deterministic in-script parameters (PyTorch-style OIHW conv weights, eval-mode BN stats)
# ---------------------------------------------------------------------------
def init_params(key, cin, cout):
    keys = jax.random.split(key, 20)
    it = iter(range(20))

    def nrm(shape, scale=0.1):
        return scale * jax.random.normal(keys[next(it)], shape, jnp.float32)

    layers = []
    c_prev = cin
    for k in (1, 3, 1, 3, 1):                 # BottleNeck conv kernel sizes
        layers.append(dict(
            w=nrm((cout, c_prev, k, k)),
            b=nrm((cout,)),
            gamma=1.0 + nrm((cout,)),
            beta=nrm((cout,)),
            mean=jnp.zeros((cout,), jnp.float32),   # BN running_mean (eval)
            var=jnp.ones((cout,), jnp.float32),     # BN running_var  (eval)
        ))
        c_prev = cout
    return {"layers": layers}


# ---------------------------------------------------------------------------
# Pure-JAX reference (independent path: jax.image.resize + lax.conv + explicit eval BN)
# ---------------------------------------------------------------------------
def forward_reference(x_nchw, params, us):
    n, c, h, w = x_nchw.shape
    y = jax.image.resize(x_nchw, (n, c, h * us, w * us), method="bilinear",
                         precision=lax.Precision.HIGHEST)
    dn = ("NCHW", "OIHW", "NCHW")
    for lyr in params["layers"]:
        pad = "SAME" if lyr["w"].shape[-1] == 3 else "VALID"
        y = lax.conv_general_dilated(y, lyr["w"], (1, 1), pad, dimension_numbers=dn,
                                     precision=lax.Precision.HIGHEST)
        y = y + lyr["b"][None, :, None, None]
        y = (y - lyr["mean"][None, :, None, None]) \
            / jnp.sqrt(lyr["var"] + _EPS)[None, :, None, None] \
            * lyr["gamma"][None, :, None, None] + lyr["beta"][None, :, None, None]
        y = jnp.maximum(y, 0.0)
    return y


# ---------------------------------------------------------------------------
if __name__ == "__main__":
    in_channel, out_channel, us = 4, 8, 2
    key = jax.random.PRNGKey(0)
    pkey, xkey = jax.random.split(key)

    params = init_params(pkey, in_channel, out_channel)
    x = jax.random.normal(xkey, (2, in_channel, 16, 16), jnp.float32)   # NCHW

    _roll_sign()   # prime the roll-convention probe outside any trace

    fwd = jax.jit(forward_pallas, static_argnums=2)
    y = jax.block_until_ready(fwd(x, params, us))

    y_ref = forward_reference(x, params, us)
    assert y.shape == (2, out_channel, 16 * us, 16 * us), y.shape
    # Kernel uses a different (but exact) matmul association than the lax reference; a modest
    # tolerance covers MXU vs HIGHEST-precision rounding while still catching semantic bugs.
    assert jnp.allclose(y, y_ref, atol=1e-3, rtol=1e-3), \
        float(jnp.max(jnp.abs(y - y_ref)))

    print("KERNEL_OK")
</pallas_src>

<mosaic_0001>
module attributes {stable_mosaic.version = 11 : i64} {
  func.func @probe(%arg0: memref<8x128xf32, #tpu.memory_space<vmem>>, %arg1: memref<8x128xf32, #tpu.memory_space<vmem>>) attributes {dimension_semantics = [], scalar_prefetch = 0 : i64, scratch_operands = 0 : i64, tpu.core_type = #tpu.core_type<tc>} {
    %c0 = arith.constant 0 : index
    %c0_0 = arith.constant 0 : index
    %0 = vector.load %arg0[%c0, %c0_0] : memref<8x128xf32, #tpu.memory_space<vmem>>, vector<8x128xf32>
    %c1_i32 = arith.constant 1 : i32
    %1 = tpu.dynamic_rotate %0 by %c1_i32 dim 1 : vector<8x128xf32>, i32 -> vector<8x128xf32>
    %c0_1 = arith.constant 0 : index
    %c0_2 = arith.constant 0 : index
    %2 = vector.load %arg1[%c0_1, %c0_2] : memref<8x128xf32, #tpu.memory_space<vmem>>, vector<8x128xf32>
    tpu.vector_store %arg1[%c0_1, %c0_2], %1 {strides = array<i32>} : memref<8x128xf32, #tpu.memory_space<vmem>>, vector<8x128xf32>,
    return
  }
}

</mosaic_0001>

<bundles_post_ra>
// kernel: tpu_custom_call.1
= control target key start
LH: loop header
LB: loop body
LE: loop exit
PB: predicated region body
PF: predicated region fallthrough
CT: control target
= control target key end

     0   :  { %6 = vsyncpa [#allocation3], 0  ;;  %s128_s0 = inlined_call_operand.hbm [shape: f32[8,128], index: 0, kind: input, shape index: {}]   ;;  %s129_s1 = inlined_call_operand.hbm [shape: f32[8,128], index: 1, kind: output, shape index: {}]  }
   0x1   :  { %7 = vsyncpa [#allocation4], 0  ;;  %s91_s6 = smov [#allocation2]   ;;  %s43_s10 = scalar_lea.hbm %s128_s0, 128 }
   0x2   :  { %s14_s7 = sshll.u32 %s91_s6, 4  ;;  %p44_p0 = scmp.ne.s32.totalorder %s128_s0, %s43_s10  ;;  %s15_s7 = int_to_ptr.vmem [resolvable:$true] %s14_s7 }
   0x3   :  { %p47_p1 = scmp.lt.u32.totalorder %s43_s10, %s128_s0 }
   0x5   :  { %p49_p2 = pnand %p47_p1, %p44_p0 }
   0x7   :  { %52 = shalt.err (!%p49_p2)
}
   0x8   :  { %s53_s15 = scalar_lea.vmem %s15_s7, 128  ;;  %p58_p4 = scmp.lt.s32.totalorder %s15_s7, %s15_s7 }
   0x9   :  { %p54_p3 = scmp.ne.s32.totalorder %s15_s7, %s53_s15  ;;  %p59_p5 = scmp.lt.s32.totalorder %s53_s15, %s53_s15 }
   0xb   :  { %p60_p6 = por %p59_p5, %p58_p4 }
   0xd   :  { %p61_p7 = pnand %p60_p6, %p54_p3 }
   0xf   :  { %64 = shalt.err (!%p61_p7)
}
  0x10   :  { %17 = dma.hbm_to_vmem [thread:$0]  %s128_s0, 128, %s15_s7, [#allocation3]  }
  0x11   :  { %87 = dma.done.wait [#allocation3], 128  }
  0x12   :  { %88 = vsyncadd [#allocation3], 4294967168  ;;  %v21_v0 = vld [vmem:[#allocation2] sm:$0xff]  ;;  %s92_s18 = smov 1   ;;  %s93_s19 = smov [#allocation5]  }
  0x13   :  { %22 = vrot.lane.b32.xlu0 %v21_v0, %s92_s18  ;;  %s31_s20 = sshll.u32 %s93_s19, 4  ;;  %s32_s20 = int_to_ptr.vmem [resolvable:$true] %s31_s20 }
  0x14   :  { %s65_s21 = scalar_lea.vmem %s32_s20, 128  ;;  %p70_p9 = scmp.lt.s32.totalorder %s32_s20, %s32_s20 }
  0x15   :  { %p66_p8 = scmp.ne.s32.totalorder %s32_s20, %s65_s21  ;;  %p71_p10 = scmp.lt.s32.totalorder %s65_s21, %s65_s21 }
  0x17   :  { %p72_p11 = por %p71_p10, %p70_p9 }
  0x19   :  { %p73_p12 = pnand %p72_p11, %p66_p8 }
  0x85   :  { %v23_v1 = vpop.permute.xlu0 %22 }
  0x86   :  { %24 = vst [vmem:[#allocation5] sm:$0xff] %v23_v1 }
  0x87   :  { %76 = shalt.err (!%p73_p12)
}
  0x88   :  { %s77_s0 = scalar_lea.hbm %s129_s1, 128 }
  0x89   :  { %p78_p13 = scmp.ne.s32.totalorder %s129_s1, %s77_s0  ;;  %p81_p0 = scmp.lt.u32.totalorder %s77_s0, %s129_s1 }
  0x8b   :  { %p83_p1 = pnand %p81_p0, %p78_p13 }
  0x8d   :  { %86 = shalt.err (!%p83_p1)
}
  0x8e   :  { %34 = dma.vmem_to_hbm [thread:$0]  %s32_s20, 128, %s129_s1, [#allocation4]  }
  0x8f   :  { %89 = dma.done.wait [#allocation4], 128  }
  0x90   :  { %90 = vsyncadd [#allocation4], 4294967168 }
  0x91   :  { %38 = vsyncpa [#allocation3], 1 }
  0x92   :  { %39 = vsyncpa [#allocation4], 1 }

</bundles_post_ra>
